<compile_context>
chip_gen: v7x
topology: tpu7x:2x2x1
jax: 0.10.0
libtpu: 0.0.40
codegen_flags: <defaults>
</compile_context>

<pallas_src>
import jax
import jax.numpy as jnp
from jax.experimental import pallas as pl
from jax.experimental.pallas import tpu as pltpu


def _make_kernel(n_mod):
    def kernel(*refs):
        mods = refs[:n_mod]                    # each (TB, D_i)        bf16  VMEM
        fws = refs[n_mod:2 * n_mod]            # each (D_i, R*O)       bf16  VMEM
        fbs = refs[2 * n_mod:3 * n_mod]        # each (1, R*O)         f32   VMEM
        s_ref = refs[3 * n_mod]                # (R*O, O) rank-reduce  f32   VMEM
        bias_ref = refs[3 * n_mod + 1]         # (1, O)                f32   VMEM
        out_ref = refs[3 * n_mod + 2]          # (TB, O)

        # One lane-dense MXU matmul per modality covering all ranks at once,
        # then the elementwise low-rank product in f32.
        fused = None
        for m_ref, fw_ref, fb_ref in zip(mods, fws, fbs):
            z = jnp.dot(m_ref[...], fw_ref[...],
                        preferred_element_type=jnp.float32) + fb_ref[...]
            fused = z if fused is None else fused * z

        # Weighted reduction over rank + fusion bias, folded into one small matmul.
        out_ref[...] = (jnp.dot(fused, s_ref[...],
                                preferred_element_type=jnp.float32)
                        + bias_ref[...]).astype(out_ref.dtype)

    return kernel


def pack_low_rank_params(factors, fusion_weights, *, output_dim, rank,
                         param_dtype=jnp.bfloat16):
    """One-time parameter repack (call this once, outside the per-step call).

    factor (R, D+1, O) -> weight slab (D, R*O) [bf16] + bias row (1, R*O) [f32].
    fusion_weights (1, R) -> block-diagonal reduction matrix S (R*O, O) [f32].
    """
    fws, fbs = [], []
    for f in factors:
        d = f.shape[1] - 1
        w = jnp.transpose(f[:, 1:, :], (1, 0, 2)).reshape(d, rank * output_dim)
        b = f[:, 0, :].reshape(1, rank * output_dim)
        fws.append(w.astype(param_dtype))
        fbs.append(b.astype(jnp.float32))
    eye = jnp.eye(output_dim, dtype=jnp.float32)
    s = (fusion_weights.reshape(rank, 1, 1).astype(jnp.float32) * eye[None, :, :]
         ).reshape(rank * output_dim, output_dim)
    return fws, fbs, s


def low_rank_tensor_fusion(modalities, packed_fws, packed_fbs, s_matrix,
                           fusion_bias, *, output_dim, rank, flatten=True,
                           batch_tile=None, compute_dtype=jnp.bfloat16):
    """Pallas implementation of LowRankTensorFusion.forward (pre-packed params)."""
    batch = modalities[0].shape[0]

    if flatten:
        mods = [m.reshape(batch, -1) for m in modalities]
    else:
        mods = list(modalities)
    mods = [m.astype(compute_dtype) for m in mods]
    n_mod = len(mods)
    ro = rank * output_dim

    # Batch tiling: multiples of 128 MXU rows when possible, else one tile.
    if batch_tile is None:
        batch_tile = batch
        for tb in (512, 256, 128):
            if batch % tb == 0:
                batch_tile = tb
                break
    assert batch % batch_tile == 0
    n_tiles = batch // batch_tile

    in_specs = []
    # modalities: one batch tile per grid step
    for m in mods:
        in_specs.append(pl.BlockSpec((batch_tile, m.shape[1]), lambda i: (i, 0)))
    # packed factor weights: full slab, constant across batch tiles
    for w in packed_fws:
        in_specs.append(pl.BlockSpec(w.shape, lambda i: (0, 0)))
    # packed factor bias rows
    for b in packed_fbs:
        in_specs.append(pl.BlockSpec((1, ro), lambda i: (0, 0)))
    # rank-reduction matrix and fusion bias
    in_specs.append(pl.BlockSpec((ro, output_dim), lambda i: (0, 0)))
    in_specs.append(pl.BlockSpec((1, output_dim), lambda i: (0, 0)))

    out = pl.pallas_call(
        _make_kernel(n_mod),
        out_shape=jax.ShapeDtypeStruct((batch, output_dim), jnp.float32),
        grid=(n_tiles,),
        in_specs=in_specs,
        out_specs=pl.BlockSpec((batch_tile, output_dim), lambda i: (i, 0)),
        compiler_params=pltpu.CompilerParams(
            dimension_semantics=("parallel",),
            vmem_limit_bytes=32 * 1024 * 1024),
    )(*mods, *packed_fws, *packed_fbs, s_matrix,
      fusion_bias.astype(jnp.float32))
    return out


def low_rank_tensor_fusion_ref(modalities, factors, fusion_weights, fusion_bias,
                               *, output_dim, flatten=True):
    """Pure-JAX f32 reference mirroring the PyTorch forward line-by-line."""
    batch = modalities[0].shape[0]
    fused = 1.0
    for modality, factor in zip(modalities, factors):
        ones = jnp.ones((batch, 1), dtype=modality.dtype)
        if flatten:
            m = jnp.concatenate([ones, modality.reshape(batch, -1)], axis=1)
        else:
            m = jnp.concatenate([ones, modality], axis=1)
        mf = jnp.matmul(m, factor)           # (R, B, O)
        fused = fused * mf
    out = jnp.matmul(fusion_weights, jnp.transpose(fused, (1, 0, 2)))
    out = jnp.squeeze(out) + fusion_bias
    return out.reshape(-1, output_dim)


def _xavier_normal(key, shape):
    # matches torch.nn.init.xavier_normal_ fan computation for >=2-D tensors
    if len(shape) > 2:
        recept = 1
        for s in shape[2:]:
            recept *= s
        fan_in, fan_out = shape[1] * recept, shape[0] * recept
    else:
        fan_in, fan_out = shape[1], shape[0]
    std = (2.0 / (fan_in + fan_out)) ** 0.5
    return std * jax.random.normal(key, shape, dtype=jnp.float32)


if __name__ == "__main__":
    # Small deterministic setup: 2 modalities, batch=2.
    # modality 0: (2, 4, 4)  -> flattened feature dim 16
    # modality 1: (2, 32)
    input_dims = [16, 32]
    output_dim = 32
    rank = 4
    batch = 2

    key = jax.random.PRNGKey(0)
    k0, k1, k2, k3, k4 = jax.random.split(key, 5)

    m0 = jax.random.normal(k0, (batch, 4, 4), dtype=jnp.float32)
    m1 = jax.random.normal(k1, (batch, 32), dtype=jnp.float32)
    modalities = [m0, m1]

    factors = [
        _xavier_normal(k2, (rank, input_dims[0] + 1, output_dim)),
        _xavier_normal(k3, (rank, input_dims[1] + 1, output_dim)),
    ]
    fusion_weights = _xavier_normal(k4, (1, rank))
    fusion_bias = jnp.zeros((1, output_dim), dtype=jnp.float32)

    # One-time parameter repack (outside the kernel call path).
    fws, fbs, s_mat = pack_low_rank_params(
        factors, fusion_weights, output_dim=output_dim, rank=rank)

    out = low_rank_tensor_fusion(
        modalities, fws, fbs, s_mat, fusion_bias,
        output_dim=output_dim, rank=rank, flatten=True)
    out = jax.block_until_ready(out)

    ref = low_rank_tensor_fusion_ref(
        modalities, factors, fusion_weights, fusion_bias,
        output_dim=output_dim, flatten=True)

    assert out.shape == (batch, output_dim), out.shape
    max_err = float(jnp.max(jnp.abs(out - ref)))
    # bf16 inputs vs f32 reference -> tolerance widened per review note.
    assert jnp.allclose(out, ref, rtol=2e-2, atol=2e-2), max_err

    print("KERNEL_OK")
</pallas_src>

<mosaic_0001>
module attributes {stable_mosaic.version = 11 : i64} {
  func.func @kernel(%arg0: i32, %arg1: memref<2x16xbf16, #tpu.memory_space<vmem>>, %arg2: memref<2x32xbf16, #tpu.memory_space<vmem>>, %arg3: memref<16x128xbf16, #tpu.memory_space<vmem>>, %arg4: memref<32x128xbf16, #tpu.memory_space<vmem>>, %arg5: memref<1x128xf32, #tpu.memory_space<vmem>>, %arg6: memref<1x128xf32, #tpu.memory_space<vmem>>, %arg7: memref<128x32xf32, #tpu.memory_space<vmem>>, %arg8: memref<1x32xf32, #tpu.memory_space<vmem>>, %arg9: memref<2x32xf32, #tpu.memory_space<vmem>>) attributes {dimension_semantics = [#tpu.dimension_semantics<parallel>], iteration_bounds = array<i64: 1>, scalar_prefetch = 0 : i64, scratch_operands = 0 : i64, tpu.core_type = #tpu.core_type<tc>, window_params = [{transform_indices = @transform_0, window_bounds = array<i64: 2, 16>}, {transform_indices = @transform_1, window_bounds = array<i64: 2, 32>}, {pipeline_mode = #tpu.pipeline_mode<synchronous>, transform_indices = @transform_2, window_bounds = array<i64: 16, 128>}, {pipeline_mode = #tpu.pipeline_mode<synchronous>, transform_indices = @transform_3, window_bounds = array<i64: 32, 128>}, {pipeline_mode = #tpu.pipeline_mode<synchronous>, transform_indices = @transform_4, window_bounds = array<i64: 1, 128>}, {pipeline_mode = #tpu.pipeline_mode<synchronous>, transform_indices = @transform_5, window_bounds = array<i64: 1, 128>}, {pipeline_mode = #tpu.pipeline_mode<synchronous>, transform_indices = @transform_6, window_bounds = array<i64: 128, 32>}, {pipeline_mode = #tpu.pipeline_mode<synchronous>, transform_indices = @transform_7, window_bounds = array<i64: 1, 32>}, {transform_indices = @transform_8, window_bounds = array<i64: 2, 32>}]} {
    %c0 = arith.constant 0 : index
    %c0_0 = arith.constant 0 : index
    %0 = vector.load %arg1[%c0, %c0_0] : memref<2x16xbf16, #tpu.memory_space<vmem>>, vector<2x16xbf16>
    %c0_1 = arith.constant 0 : index
    %c0_2 = arith.constant 0 : index
    %1 = vector.load %arg3[%c0_1, %c0_2] : memref<16x128xbf16, #tpu.memory_space<vmem>>, vector<16x128xbf16>
    %cst = arith.constant dense<0.000000e+00> : vector<2x128xf32>
    %2 = tpu.matmul %0, %1, %cst {dimension_numbers = #tpu.dot_dimension_numbers<[1], [0], [0], [1], [0, 0, 1, 1], [], []>} : vector<2x16xbf16>, vector<16x128xbf16>, vector<2x128xf32> -> vector<2x128xf32>
    %c0_3 = arith.constant 0 : index
    %c0_4 = arith.constant 0 : index
    %3 = vector.load %arg5[%c0_3, %c0_4] : memref<1x128xf32, #tpu.memory_space<vmem>>, vector<1x128xf32>
    %4 = vector.broadcast %3 : vector<1x128xf32> to vector<2x128xf32>
    %5 = arith.addf %2, %4 : vector<2x128xf32>
    %c0_5 = arith.constant 0 : index
    %c0_6 = arith.constant 0 : index
    %6 = vector.load %arg2[%c0_5, %c0_6] : memref<2x32xbf16, #tpu.memory_space<vmem>>, vector<2x32xbf16>
    %c0_7 = arith.constant 0 : index
    %c0_8 = arith.constant 0 : index
    %7 = vector.load %arg4[%c0_7, %c0_8] : memref<32x128xbf16, #tpu.memory_space<vmem>>, vector<32x128xbf16>
    %cst_9 = arith.constant dense<0.000000e+00> : vector<2x128xf32>
    %8 = tpu.matmul %6, %7, %cst_9 {dimension_numbers = #tpu.dot_dimension_numbers<[1], [0], [0], [1], [0, 0, 1, 1], [], []>} : vector<2x32xbf16>, vector<32x128xbf16>, vector<2x128xf32> -> vector<2x128xf32>
    %c0_10 = arith.constant 0 : index
    %c0_11 = arith.constant 0 : index
    %9 = vector.load %arg6[%c0_10, %c0_11] : memref<1x128xf32, #tpu.memory_space<vmem>>, vector<1x128xf32>
    %10 = vector.broadcast %9 : vector<1x128xf32> to vector<2x128xf32>
    %11 = arith.addf %8, %10 : vector<2x128xf32>
    %12 = arith.mulf %5, %11 : vector<2x128xf32>
    %c0_12 = arith.constant 0 : index
    %c0_13 = arith.constant 0 : index
    %13 = vector.load %arg7[%c0_12, %c0_13] : memref<128x32xf32, #tpu.memory_space<vmem>>, vector<128x32xf32>
    %cst_14 = arith.constant dense<0.000000e+00> : vector<2x32xf32>
    %14 = tpu.matmul %12, %13, %cst_14 {dimension_numbers = #tpu.dot_dimension_numbers<[1], [0], [0], [1], [0, 0, 1, 1], [], []>} : vector<2x128xf32>, vector<128x32xf32>, vector<2x32xf32> -> vector<2x32xf32>
    %c0_15 = arith.constant 0 : index
    %c0_16 = arith.constant 0 : index
    %15 = vector.load %arg8[%c0_15, %c0_16] : memref<1x32xf32, #tpu.memory_space<vmem>>, vector<1x32xf32>
    %16 = vector.broadcast %15 : vector<1x32xf32> to vector<2x32xf32>
    %17 = arith.addf %14, %16 : vector<2x32xf32>
    %c0_17 = arith.constant 0 : index
    %c0_18 = arith.constant 0 : index
    %18 = vector.load %arg9[%c0_17, %c0_18] : memref<2x32xf32, #tpu.memory_space<vmem>>, vector<2x32xf32>
    tpu.vector_store %arg9[%c0_17, %c0_18], %17 {strides = array<i32>} : memref<2x32xf32, #tpu.memory_space<vmem>>, vector<2x32xf32>,
    return
  }
  func.func @transform_0(%arg0: i32) -> (i32, i32) {
    %c0_i32 = arith.constant 0 : i32
    %c0_i32_0 = arith.constant 0 : i32
    return %arg0, %c0_i32 : i32, i32
  }
  func.func @transform_1(%arg0: i32) -> (i32, i32) {
    %c0_i32 = arith.constant 0 : i32
    %c0_i32_0 = arith.constant 0 : i32
    return %arg0, %c0_i32 : i32, i32
  }
  func.func @transform_2(%arg0: i32) -> (i32, i32) {
    %c0_i32 = arith.constant 0 : i32
    %c0_i32_0 = arith.constant 0 : i32
    %c0_i32_1 = arith.constant 0 : i32
    return %c0_i32, %c0_i32_0 : i32, i32
  }
  func.func @transform_3(%arg0: i32) -> (i32, i32) {
    %c0_i32 = arith.constant 0 : i32
    %c0_i32_0 = arith.constant 0 : i32
    %c0_i32_1 = arith.constant 0 : i32
    return %c0_i32, %c0_i32_0 : i32, i32
  }
  func.func @transform_4(%arg0: i32) -> (i32, i32) {
    %c0_i32 = arith.constant 0 : i32
    %c0_i32_0 = arith.constant 0 : i32
    %c0_i32_1 = arith.constant 0 : i32
    return %c0_i32, %c0_i32_0 : i32, i32
  }
  func.func @transform_5(%arg0: i32) -> (i32, i32) {
    %c0_i32 = arith.constant 0 : i32
    %c0_i32_0 = arith.constant 0 : i32
    %c0_i32_1 = arith.constant 0 : i32
    return %c0_i32, %c0_i32_0 : i32, i32
  }
  func.func @transform_6(%arg0: i32) -> (i32, i32) {
    %c0_i32 = arith.constant 0 : i32
    %c0_i32_0 = arith.constant 0 : i32
    %c0_i32_1 = arith.constant 0 : i32
    return %c0_i32, %c0_i32_0 : i32, i32
  }
  func.func @transform_7(%arg0: i32) -> (i32, i32) {
    %c0_i32 = arith.constant 0 : i32
    %c0_i32_0 = arith.constant 0 : i32
    %c0_i32_1 = arith.constant 0 : i32
    return %c0_i32, %c0_i32_0 : i32, i32
  }
  func.func @transform_8(%arg0: i32) -> (i32, i32) {
    %c0_i32 = arith.constant 0 : i32
    %c0_i32_0 = arith.constant 0 : i32
    return %arg0, %c0_i32 : i32, i32
  }
}

</mosaic_0001>

<bundles_post_ra>
// kernel: tpu_custom_call.1
= control target key start
LH: loop header
LB: loop body
LE: loop exit
PB: predicated region body
PF: predicated region fallthrough
CT: control target
= control target key end

     0   :  { %v403_v1 = vmov 0.0   ;;  %vm404_vm0 = vmmov 0   ;;  %vm47_vm1 = vcmask 130048   ;;  %v405_v4 = vmov 0.0|0.0   ;;  %s539_s0 = inlined_call_operand.vmem [shape: bf16[2,16], index: 0, kind: input, shape index: {}]   ;;  %s540_s1 = inlined_call_operand.vmem [shape: bf16[2,32], index: 1, kind: input, shape index: {}]   ;;  %s541_s2 = inlined_call_operand.vmem [shape: bf16[16,128], index: 2, kind: input, shape index: {}]   ;;  %s542_s3 = inlined_call_operand.vmem [shape: bf16[32,128], index: 3, kind: input, shape index: {}]   ;;  %s543_s4 = inlined_call_operand.vmem [shape: f32[1,128], index: 4, kind: input, shape index: {}]   ;;  %s544_s5 = inlined_call_operand.vmem [shape: f32[1,128], index: 5, kind: input, shape index: {}]   ;;  %s545_s6 = inlined_call_operand.vmem [shape: f32[128,32], index: 6, kind: input, shape index: {}]   ;;  %s546_s7 = inlined_call_operand.vmem [shape: f32[1,32], index: 7, kind: input, shape index: {}]   ;;  %s547_s8 = inlined_call_operand.hbm [shape: f32[2,32], index: 8, kind: output, shape index: {}]  }
   0x1   :  { %v376_v0 = vld [vmem:[%s541_s2] sm:$0xff]   ;;  %299 = vmatprep.subr.bf16.mxu1 %v403_v1  ;;  %301 = vmatprep.mubr.msk.bf16.mxu1 %vm404_vm0, %v403_v1  ;;  %v161_v6 = vld [vmem:[%s545_s6 + $0x8] sm:$0xff]  ;;  %v162_v7 = vld [vmem:[%s545_s6 + $0x10] sm:$0xff] }
   0x2   :  { %v31_v2 = vld [vmem:[%s539_s0] sm:$0x1]  ;;  %300 = vmatpush3.bf16.msra.mxu1 %v376_v0  ;;  %345 = vmatprep.mubr.msk.f32.mxu0 %vm404_vm0, %v403_v1  ;;  %v163_v9 = vld [vmem:[%s545_s6 + $0x18] sm:$0xff]  ;;  %v378_v10 = vld [vmem:[%s542_s3 + $0x8] sm:$0xff]  }
   0x3   :  { %v377_v3 = vld [vmem:[%s542_s3] sm:$0xff]   ;;  %305 = vmatprep.subr.bf16.mxu1 %v403_v1  ;;  %348 = vmatprep.subr.bf16.mxu0 %v405_v4  ;;  %v352_v11 = vpack.c.bf16 %v163_v9, %v162_v7 }
   0x4   :  { %v160_v5 = vld [vmem:[%s545_s6] sm:$0xff] }
   0x5   :  { %302 = vmatmul.mubr.msk.bf16.vlgmr.msra.gmra.mrb[0].mxu1 %vm47_vm1, %v31_v2  ;;  %v349_v8 = vpack.c.bf16 %v161_v6, %v160_v5 }
   0x6   :  { %306 = vmatpush3.bf16.msra.mxu1 %v377_v3  ;;  %309 = vmatprep.mubr.msk.bf16.mxu1 %vm404_vm0, %v403_v1 }
   0x7   :  { %307 = vmatprep.subr.bf16.mxu1 %v403_v1  ;;  %350 = vmatpush3.bf16.msra.mxu0 %v349_v8 }
   0x8   :  { %13 = vsyncpa [#allocation3], 0  ;;  %351 = vmatprep.subr.bf16.mxu0 %v405_v4  ;;  %v164_v12 = vld [vmem:[%s545_s6 + $0x20] sm:$0xff]  ;;  %v165_v13 = vld [vmem:[%s545_s6 + $0x28] sm:$0xff]  ;;  %vm115_vm2 = vcmask 261120   ;;  %s406_s24 = smov [#allocation2]  }
   0x9   :  { %v91_v14 = vld [vmem:[%s540_s1] sm:$0x1]  ;;  %v355_v15 = vpack.c.bf16 %v165_v13, %v164_v12  ;;  %v166_v16 = vld [vmem:[%s545_s6 + $0x30] sm:$0xff]  ;;  %v167_v17 = vld [vmem:[%s545_s6 + $0x38] sm:$0xff]  ;;  %s261_s3 = sshll.u32 %s406_s24, 4  ;;  %vm253_vm3 = vcmask 254976   ;;  %s262_s3 = int_to_ptr.vmem [resolvable:$true] %s261_s3 }
   0xa   :  { %308 = vmatpush3.bf16.msra.mxu1 %v378_v10  ;;  %v358_v18 = vpack.c.bf16 %v167_v17, %v166_v16  ;;  %v168_v19 = vld [vmem:[%s545_s6 + $0x40] sm:$0xff]  ;;  %v169_v20 = vld [vmem:[%s545_s6 + $0x48] sm:$0xff]  ;;  %v170_v22 = vld [vmem:[%s545_s6 + $0x50] sm:$0xff]  ;;  %p384_p1 = scmp.lt.s32.totalorder %s262_s3, %s262_s3 }
   0xb   :  { %353 = vmatpush3.bf16.msra.mxu0 %v352_v11  ;;  %v361_v21 = vpack.c.bf16 %v169_v20, %v168_v19  ;;  %v171_v23 = vld [vmem:[%s545_s6 + $0x58] sm:$0xff]  ;;  %v172_v25 = vld [vmem:[%s545_s6 + $0x60] sm:$0xff]  ;;  %v173_v26 = vld [vmem:[%s545_s6 + $0x68] sm:$0xff] }
   0xc   :  { %354 = vmatprep.subr.bf16.mxu0 %v405_v4  ;;  %v364_v24 = vpack.c.bf16 %v171_v23, %v170_v22  ;;  %v367_v27 = vpack.c.bf16 %v173_v26, %v172_v25  ;;  %v174_v28 = vld [vmem:[%s545_s6 + $0x70] sm:$0xff]  ;;  %v175_v29 = vld [vmem:[%s545_s6 + $0x78] sm:$0xff]  ;;  %v269_v35 = vld [vmem:[%s543_s4] ss:$0 sm:$0xff]  ;;  %s379_s4 = scalar_lea.vmem %s262_s3, 32 }
   0xd   :  { %310 = vmatmul.mubr.msk.bf16.vlgmr.msra.gmra.mrb[4].mxu1 %vm115_vm2, %v91_v14  ;;  %v370_v30 = vpack.c.bf16 %v175_v29, %v174_v28  ;;  %v272_v36 = vld [vmem:[%s544_s5] ss:$0 sm:$0xff]  ;;  %p380_p0 = scmp.ne.s32.totalorder %s262_s3, %s379_s4  ;;  %p385_p2 = scmp.lt.s32.totalorder %s379_s4, %s379_s4 }
   0xe   :  { %v276_v44 = vld [vmem:[%s546_s7] ss:$0 sm:$0xff] }
   0xf   :  { %356 = vmatpush3.bf16.msra.mxu0 %v355_v15  ;;  %p386_p3 = por %p385_p2, %p384_p1 }
  0x10   :  { %357 = vmatprep.subr.bf16.mxu0 %v405_v4 }
  0x11   :  { %p387_p4 = pnand %p386_p3, %p380_p0 }
  0x13   :  { %359 = vmatpush3.bf16.msra.mxu0 %v358_v18 }
  0x14   :  { %360 = vmatprep.subr.bf16.mxu0 %v405_v4 }
  0x17   :  { %362 = vmatpush3.bf16.msra.mxu0 %v361_v21 }
  0x18   :  { %363 = vmatprep.subr.bf16.mxu0 %v405_v4 }
  0x1b   :  { %365 = vmatpush3.bf16.msra.mxu0 %v364_v24 }
  0x1c   :  { %366 = vmatprep.subr.bf16.mxu0 %v405_v4 }
  0x1f   :  { %368 = vmatpush3.bf16.msra.mxu0 %v367_v27 }
  0x20   :  { %369 = vmatprep.subr.bf16.mxu0 %v405_v4 }
  0x23   :  { %371 = vmatpush3.bf16.msra.mxu0 %v370_v30 }
  0xd8   :  { %v85_v31 = vpop.f32.mrb[0].mxu1 }
  0xd9   :  { %v303_v32 = vpop.f32.mrb[1].mxu1  ;;  %v86_v38 = vadd.f32 %v269_v35, %v85_v31 }
  0xda   :  { %v88_v33 = vpop.f32.mrb[2].mxu1 }
  0xdb   :  { %v304_v34 = vpop.f32.mrb[3].mxu1 }
  0xe0   :  { %v153_v37 = vpop.f32.mrb[4].mxu1 }
  0xe1   :  { %v154_v39 = vadd.f32 %v272_v36, %v153_v37  ;;  %v311_v40 = vpop.f32.mrb[5].mxu1 }
  0xe2   :  { %v156_v41 = vpop.f32.mrb[6].mxu1 }
  0xe3   :  { %v159_v42 = vmul.f32 %v154_v39, %v86_v38  ;;  %v312_v43 = vpop.f32.mrb[7].mxu1 }
  0xe5   :  { %346 = vmatmul.mubr.f32.vlgmr.msra.gmra.mrb[0].mxu0 %v159_v42 }
 0x1b8   :  { %v249_v45 = vpop.f32.mrb[0].mxu0 }
 0x1b9   :  { %v250_v46 = vadd.f32 %v276_v44, %v249_v45  ;;  %v347_v47 = vpop.f32.mrb[1].mxu0 }
 0x1bb   :  { %254 = vst.msk [vmem:[#allocation2] sm:$0x3] %vm253_vm3, %v250_v46 }
 0x1bc   :  { %390 = shalt.err (!%p387_p4)
}
 0x1bd   :  { %s391_s26 = scalar_lea.hbm %s547_s8, 32 }
 0x1be   :  { %p392_p5 = scmp.ne.s32.totalorder %s547_s8, %s391_s26  ;;  %p395_p6 = scmp.lt.u32.totalorder %s391_s26, %s547_s8 }
 0x1c0   :  { %p397_p7 = pnand %p395_p6, %p392_p5 }
 0x1c2   :  { %400 = shalt.err (!%p397_p7)
}
 0x1c3   :  { %264 = dma.vmem_to_hbm [thread:$0]  %s262_s3, 32, %s547_s8, [#allocation3]  }
 0x1c4   :  { %401 = dma.done.wait [#allocation3], 32  }
 0x1c5   :  { %402 = vsyncadd [#allocation3], 4294967264 }
 0x1c6   :  { %268 = vsyncpa [#allocation3], 1 }

</bundles_post_ra>
